<compile_context>
chip_gen: v7x
topology: tpu7x:2x2x1
jax: 0.10.0
libtpu: 0.0.40
codegen_flags: <defaults>
</compile_context>

<pallas_src>
import jax
import jax.numpy as jnp
from jax.experimental import pallas as pl
from jax.experimental.pallas import tpu as pltpu


# ----------------------------- fused TCN kernel ------------------------------

def _make_tcn_kernel(layer_cfgs, bn, L, compute_dtype):
    """Kernel running the whole TCN stack for `bn` batch rows per grid step.

    layer_cfgs: list of dicts of static ints/bools: c_in, c_out, k, d, has_ds.
    Ref order: x_ref, <per-layer weights>, o_ref, stage_scratch.
    Per-layer weights: w1_p, b1, w2_p, b2 [, w_ds_p, b_ds].
    """
    n_w = sum(4 + (2 if c["has_ds"] else 0) for c in layer_cfgs)
    bnL = bn * L

    def kernel(x_ref, *rest):
        w_refs = rest[:n_w]
        o_ref = rest[n_w]
        stage = rest[n_w + 1]                    # VMEM (max_rows, bn*L) scratch

        def stage_taps(sample_cols, c_in, k, d):
            """Pack the K dilated causal taps along sublanes for the whole tile.

            sample_cols(bi, width) -> (c_in, width): the leading `width`
            time-steps of sample bi of the layer input. The causal left padding
            / chomp is realized by the zero + offset writes. Returns the
            (K*C_in, bn*L) staged contraction matrix (a value, safe to reuse).
            """
            pad = (k - 1) * d
            for j in range(k):                   # static tap loop (staging only)
                shift = pad - j * d              # static >= 0; 0 for last tap
                r0 = j * c_in
                for bi in range(bn):             # static batch-tile loop
                    c0 = bi * L
                    if shift > 0:
                        stage[pl.ds(r0, c_in), pl.ds(c0, shift)] = jnp.zeros(
                            (c_in, shift), compute_dtype)
                        stage[pl.ds(r0, c_in), pl.ds(c0 + shift, L - shift)] = (
                            sample_cols(bi, L - shift))
                    else:
                        stage[pl.ds(r0, c_in), pl.ds(c0, L)] = sample_cols(bi, L)
            return stage[pl.ds(0, k * c_in), pl.ds(0, bnL)]

        # Load the input tile once (per-sample slabs, reused by layer-0 staging).
        x_rows = [x_ref[bi].astype(compute_dtype) for bi in range(bn)]

        act = None                               # (C, bn*L) value after layer 0
        wi = 0
        for cfg in layer_cfgs:
            c_in, c_out, k, d, has_ds = (cfg["c_in"], cfg["c_out"], cfg["k"],
                                         cfg["d"], cfg["has_ds"])
            w1, b1, w2, b2 = w_refs[wi:wi + 4]
            wi += 4

            if act is None:
                def in_cols(bi, w):
                    return x_rows[bi][:, :w]
            else:
                def in_cols(bi, w, a=act):
                    return a[:, bi * L: bi * L + w]

            # conv1 -> chomp -> relu1 (dropout1 = identity): ONE MXU matmul.
            staged1 = stage_taps(in_cols, c_in, k, d)          # (K*C_in, bn*L)
            # Last tap is unshifted -> these rows ARE the layer input (residual).
            act_in = staged1[(k - 1) * c_in: k * c_in, :]      # (C_in, bn*L)

            h = jnp.dot(w1[...], staged1, preferred_element_type=jnp.float32)
            h = jnp.maximum(h + b1[...], 0.0).astype(compute_dtype)

            # residual branch (1x1 conv or identity), one matmul for the tile.
            if has_ds:
                w_ds, b_ds = w_refs[wi:wi + 2]
                wi += 2
                res = jnp.dot(w_ds[...], act_in,
                              preferred_element_type=jnp.float32) + b_ds[...]
            else:
                res = act_in.astype(jnp.float32)

            # conv2 -> chomp -> relu2 (dropout2 = identity): ONE MXU matmul.
            def h_cols(bi, w, a=h):
                return a[:, bi * L: bi * L + w]

            staged2 = stage_taps(h_cols, c_out, k, d)          # (K*C_out, bn*L)
            o = jnp.dot(w2[...], staged2, preferred_element_type=jnp.float32)
            o = jnp.maximum(o + b2[...], 0.0)

            # final block relu
            act = jnp.maximum(o + res, 0.0).astype(compute_dtype)

        o_ref[...] = act.astype(o_ref.dtype)     # lane-dense (C_out, bn*L) store

    return kernel


def temporal_conv_net(x, params, kernel_sizes, dilations, *,
                      batch_tile=None, compute_dtype=jnp.float32):
    """Fused TCN forward: x (N, C_in0, L) -> (N, C_out_last, L)."""
    N, c_in0, L = x.shape
    bn = N if batch_tile is None else batch_tile
    assert N % bn == 0
    # Keep output blocks lane-legal: either whole batch per step or 128-multiple.
    assert bn == N or (bn * L) % 128 == 0

    layer_cfgs, flat_args, flat_specs = [], [], []
    max_rows = 0
    for i, p in enumerate(params):
        k, d = kernel_sizes[i], dilations[i]
        c_out = p["b1"].shape[0]
        c_in = p["w1_p"].shape[1] // k
        has_ds = p["w_ds_p"] is not None
        layer_cfgs.append(dict(c_in=c_in, c_out=c_out, k=k, d=d, has_ds=has_ds))
        max_rows = max(max_rows, k * c_in, k * c_out)
        names = ["w1_p", "b1", "w2_p", "b2"] + (["w_ds_p", "b_ds"] if has_ds else [])
        for name in names:
            a = p[name]
            if name.endswith("_p"):              # packed weights in compute dtype
                a = a.astype(compute_dtype)
            flat_args.append(a)
            # 2-D weight/bias tensors, grid-invariant (VMEM-resident).
            flat_specs.append(pl.BlockSpec(a.shape, lambda n: (0, 0)))
    c_out_last = layer_cfgs[-1]["c_out"]

    kernel = _make_tcn_kernel(layer_cfgs, bn, L, compute_dtype)

    out_flat = pl.pallas_call(
        kernel,
        out_shape=jax.ShapeDtypeStruct((c_out_last, N * L), compute_dtype),
        grid_spec=pltpu.PrefetchScalarGridSpec(
            num_scalar_prefetch=0,
            grid=(N // bn,),
            in_specs=[pl.BlockSpec((bn, c_in0, L), lambda n: (n, 0, 0))]
                     + flat_specs,
            out_specs=pl.BlockSpec((c_out_last, bn * L), lambda n: (0, n)),
            scratch_shapes=[pltpu.VMEM((max_rows, bn * L), compute_dtype)],
        ),
        compiler_params=pltpu.CompilerParams(
            dimension_semantics=("parallel",),   # batch axis -> both TCs on v7x
            vmem_limit_bytes=32 * 1024 * 1024,
        ),
    )(x.astype(compute_dtype), *flat_args)

    # (C_out, N*L) -> (N, C_out, L): layout plumbing outside the kernel.
    return jnp.transpose(out_flat.reshape(c_out_last, N, L), (1, 0, 2))


# ----------------------------- parameter setup ------------------------------

def _weight_norm_effective(key, c_out, c_in, k):
    """weight_norm(Conv1d).weight right after init_weights(): v ~ N(0,0.01), g=||v||."""
    v = 0.01 * jax.random.normal(key, (c_out, c_in, k), jnp.float32)
    norm = jnp.sqrt(jnp.sum(v * v, axis=(1, 2), keepdims=True))
    g = norm                                     # g initialized to ||v||
    w = g * v / jnp.maximum(norm, 1e-12)         # == v at init; keep for fidelity
    return jnp.transpose(w, (2, 0, 1))           # -> (K, C_out, C_in)


def _bias(key, c_out, fan_in):
    bound = 1.0 / jnp.sqrt(jnp.float32(fan_in))
    return jax.random.uniform(key, (c_out, 1), jnp.float32, -bound, bound)


def _pack_weight(w_kco_ci):
    """(K, C_out, C_in) -> (C_out, K*C_in), matching the kernel's staged layout."""
    k, c_out, c_in = w_kco_ci.shape
    return jnp.transpose(w_kco_ci, (1, 0, 2)).reshape(c_out, k * c_in)


def init_tcn_params(key, input_channels, output_channels, kernel_sizes, dilations):
    params = []
    for i in range(len(kernel_sizes)):
        c_in, c_out, k = input_channels[i], output_channels[i], kernel_sizes[i]
        key, k1, k2, k3, k4, k5, k6 = jax.random.split(key, 7)
        w1 = _weight_norm_effective(k1, c_out, c_in, k)
        w2 = _weight_norm_effective(k3, c_out, c_out, k)
        p = {
            "w1": w1, "w1_p": _pack_weight(w1), "b1": _bias(k2, c_out, c_in * k),
            "w2": w2, "w2_p": _pack_weight(w2), "b2": _bias(k4, c_out, c_out * k),
            "w_ds": None, "w_ds_p": None, "b_ds": None,
        }
        if c_in != c_out:                        # downsample = Conv1d(c_in, c_out, 1)
            w_ds = 0.01 * jax.random.normal(k5, (c_out, c_in, 1), jnp.float32)
            w_ds = jnp.transpose(w_ds, (2, 0, 1))            # (1, C_out, C_in)
            p["w_ds"] = w_ds
            p["w_ds_p"] = _pack_weight(w_ds)                 # (C_out, C_in)
            p["b_ds"] = _bias(k6, c_out, c_in)
        params.append(p)
    return params


# ------------------------------ pure-JAX reference --------------------------

def _ref_conv(x, w, b, dilation, apply_relu=False, residual=None):
    N, C_in, L = x.shape
    K, C_out, _ = w.shape
    P = (K - 1) * dilation
    xpad = jnp.pad(x, ((0, 0), (0, 0), (P, 0)))
    out = jnp.zeros((N, C_out, L), jnp.float32) + b.reshape(1, C_out, 1)
    for j in range(K):
        out = out + jnp.einsum("oc,ncl->nol", w[j],
                               xpad[:, :, j * dilation:j * dilation + L])
    if apply_relu:
        out = jnp.maximum(out, 0.0)
    if residual is not None:
        out = jnp.maximum(out + residual, 0.0)
    return out


def _ref_tcn(x, params, kernel_sizes, dilations):
    for i, p in enumerate(params):
        h = _ref_conv(x, p["w1"], p["b1"], dilations[i], apply_relu=True)
        res = x if p["w_ds"] is None else _ref_conv(x, p["w_ds"], p["b_ds"], 1)
        x = _ref_conv(h, p["w2"], p["b2"], dilations[i], apply_relu=True, residual=res)
    return x


# ---------------------------------- main -------------------------------------

if __name__ == "__main__":
    key = jax.random.PRNGKey(0)
    k_x, k_p = jax.random.split(key)

    # TemporalConvNet(input_channels=[4, 8], output_channels=[8, 8],
    #                 num_blocks=2, kernel_sizes=[3, 3], dilations=[1, 2])
    input_channels = [4, 8]
    output_channels = [8, 8]
    kernel_sizes = [3, 3]
    dilations = [1, 2]

    N, L = 2, 16
    x = jax.random.normal(k_x, (N, input_channels[0], L), jnp.float32)
    params = init_tcn_params(k_p, input_channels, output_channels,
                             kernel_sizes, dilations)

    out = temporal_conv_net(x, params, kernel_sizes, dilations)
    out = jax.block_until_ready(out)

    ref = _ref_tcn(x, params, kernel_sizes, dilations)
    assert out.shape == (N, output_channels[-1], L)
    assert jnp.allclose(out, ref, atol=1e-5, rtol=1e-5)

    # TODO(synk): nn.Dropout is identity here (eval-mode); pass
    # compute_dtype=jnp.bfloat16 for v6e/v7x throughput (f32 accumulation kept).
    print("KERNEL_OK")
</pallas_src>

<mosaic_0001>
module attributes {stable_mosaic.version = 11 : i64} {
  func.func @kernel(%arg0: i32, %arg1: memref<2x4x16xf32, #tpu.memory_space<vmem>>, %arg2: memref<8x12xf32, #tpu.memory_space<vmem>>, %arg3: memref<8x1xf32, #tpu.memory_space<vmem>>, %arg4: memref<8x24xf32, #tpu.memory_space<vmem>>, %arg5: memref<8x1xf32, #tpu.memory_space<vmem>>, %arg6: memref<8x4xf32, #tpu.memory_space<vmem>>, %arg7: memref<8x1xf32, #tpu.memory_space<vmem>>, %arg8: memref<8x24xf32, #tpu.memory_space<vmem>>, %arg9: memref<8x1xf32, #tpu.memory_space<vmem>>, %arg10: memref<8x24xf32, #tpu.memory_space<vmem>>, %arg11: memref<8x1xf32, #tpu.memory_space<vmem>>, %arg12: memref<8x32xf32, #tpu.memory_space<vmem>>, %arg13: memref<24x32xf32, #tpu.memory_space<vmem>>) attributes {dimension_semantics = [#tpu.dimension_semantics<parallel>], iteration_bounds = array<i64: 1>, scalar_prefetch = 0 : i64, scratch_operands = 1 : i64, tpu.core_type = #tpu.core_type<tc>, window_params = [{transform_indices = @transform_0, window_bounds = array<i64: 2, 4, 16>}, {pipeline_mode = #tpu.pipeline_mode<synchronous>, transform_indices = @transform_1, window_bounds = array<i64: 8, 12>}, {pipeline_mode = #tpu.pipeline_mode<synchronous>, transform_indices = @transform_2, window_bounds = array<i64: 8, 1>}, {pipeline_mode = #tpu.pipeline_mode<synchronous>, transform_indices = @transform_3, window_bounds = array<i64: 8, 24>}, {pipeline_mode = #tpu.pipeline_mode<synchronous>, transform_indices = @transform_4, window_bounds = array<i64: 8, 1>}, {pipeline_mode = #tpu.pipeline_mode<synchronous>, transform_indices = @transform_5, window_bounds = array<i64: 8, 4>}, {pipeline_mode = #tpu.pipeline_mode<synchronous>, transform_indices = @transform_6, window_bounds = array<i64: 8, 1>}, {pipeline_mode = #tpu.pipeline_mode<synchronous>, transform_indices = @transform_7, window_bounds = array<i64: 8, 24>}, {pipeline_mode = #tpu.pipeline_mode<synchronous>, transform_indices = @transform_8, window_bounds = array<i64: 8, 1>}, {pipeline_mode = #tpu.pipeline_mode<synchronous>, transform_indices = @transform_9, window_bounds = array<i64: 8, 24>}, {pipeline_mode = #tpu.pipeline_mode<synchronous>, transform_indices = @transform_10, window_bounds = array<i64: 8, 1>}, {transform_indices = @transform_11, window_bounds = array<i64: 8, 32>}]} {
    %c0 = arith.constant 0 : index
    %c0_0 = arith.constant 0 : index
    %c0_1 = arith.constant 0 : index
    %0 = vector.load %arg1[%c0, %c0_0, %c0_1] : memref<2x4x16xf32, #tpu.memory_space<vmem>>, vector<1x4x16xf32>
    %1 = vector.shape_cast %0 : vector<1x4x16xf32> to vector<4x16xf32>
    %c1 = arith.constant 1 : index
    %c0_2 = arith.constant 0 : index
    %c0_3 = arith.constant 0 : index
    %2 = vector.load %arg1[%c1, %c0_2, %c0_3] : memref<2x4x16xf32, #tpu.memory_space<vmem>>, vector<1x4x16xf32>
    %3 = vector.shape_cast %2 : vector<1x4x16xf32> to vector<4x16xf32>
    %cst = arith.constant 0.000000e+00 : f32
    %4 = vector.broadcast %cst : f32 to vector<4x2xf32>
    %c0_4 = arith.constant 0 : index
    %c0_5 = arith.constant 0 : index
    %5 = vector.load %arg13[%c0_4, %c0_5] : memref<24x32xf32, #tpu.memory_space<vmem>>, vector<4x2xf32>
    tpu.vector_store %arg13[%c0_4, %c0_5], %4 {strides = array<i32>} : memref<24x32xf32, #tpu.memory_space<vmem>>, vector<4x2xf32>,
    %6 = vector.extract_strided_slice %1 {offsets = [0, 0], sizes = [4, 14], strides = [1, 1]} : vector<4x16xf32> to vector<4x14xf32>
    %c0_6 = arith.constant 0 : index
    %c2 = arith.constant 2 : index
    %7 = vector.load %arg13[%c0_6, %c2] : memref<24x32xf32, #tpu.memory_space<vmem>>, vector<4x14xf32>
    tpu.vector_store %arg13[%c0_6, %c2], %6 {strides = array<i32>} : memref<24x32xf32, #tpu.memory_space<vmem>>, vector<4x14xf32>,
    %cst_7 = arith.constant 0.000000e+00 : f32
    %8 = vector.broadcast %cst_7 : f32 to vector<4x2xf32>
    %c0_8 = arith.constant 0 : index
    %c16 = arith.constant 16 : index
    %9 = vector.load %arg13[%c0_8, %c16] : memref<24x32xf32, #tpu.memory_space<vmem>>, vector<4x2xf32>
    tpu.vector_store %arg13[%c0_8, %c16], %8 {strides = array<i32>} : memref<24x32xf32, #tpu.memory_space<vmem>>, vector<4x2xf32>,
    %10 = vector.extract_strided_slice %3 {offsets = [0, 0], sizes = [4, 14], strides = [1, 1]} : vector<4x16xf32> to vector<4x14xf32>
    %c0_9 = arith.constant 0 : index
    %c18 = arith.constant 18 : index
    %11 = vector.load %arg13[%c0_9, %c18] : memref<24x32xf32, #tpu.memory_space<vmem>>, vector<4x14xf32>
    tpu.vector_store %arg13[%c0_9, %c18], %10 {strides = array<i32>} : memref<24x32xf32, #tpu.memory_space<vmem>>, vector<4x14xf32>,
    %cst_10 = arith.constant 0.000000e+00 : f32
    %12 = vector.broadcast %cst_10 : f32 to vector<4x1xf32>
    %c4 = arith.constant 4 : index
    %c0_11 = arith.constant 0 : index
    %13 = vector.load %arg13[%c4, %c0_11] : memref<24x32xf32, #tpu.memory_space<vmem>>, vector<4x1xf32>
    tpu.vector_store %arg13[%c4, %c0_11], %12 {strides = array<i32>} : memref<24x32xf32, #tpu.memory_space<vmem>>, vector<4x1xf32>,
    %14 = vector.extract_strided_slice %1 {offsets = [0, 0], sizes = [4, 15], strides = [1, 1]} : vector<4x16xf32> to vector<4x15xf32>
    %c4_12 = arith.constant 4 : index
    %c1_13 = arith.constant 1 : index
    %15 = vector.load %arg13[%c4_12, %c1_13] : memref<24x32xf32, #tpu.memory_space<vmem>>, vector<4x15xf32>
    tpu.vector_store %arg13[%c4_12, %c1_13], %14 {strides = array<i32>} : memref<24x32xf32, #tpu.memory_space<vmem>>, vector<4x15xf32>,
    %cst_14 = arith.constant 0.000000e+00 : f32
    %16 = vector.broadcast %cst_14 : f32 to vector<4x1xf32>
    %c4_15 = arith.constant 4 : index
    %c16_16 = arith.constant 16 : index
    %17 = vector.load %arg13[%c4_15, %c16_16] : memref<24x32xf32, #tpu.memory_space<vmem>>, vector<4x1xf32>
    tpu.vector_store %arg13[%c4_15, %c16_16], %16 {strides = array<i32>} : memref<24x32xf32, #tpu.memory_space<vmem>>, vector<4x1xf32>,
    %18 = vector.extract_strided_slice %3 {offsets = [0, 0], sizes = [4, 15], strides = [1, 1]} : vector<4x16xf32> to vector<4x15xf32>
    %c4_17 = arith.constant 4 : index
    %c17 = arith.constant 17 : index
    %19 = vector.load %arg13[%c4_17, %c17] : memref<24x32xf32, #tpu.memory_space<vmem>>, vector<4x15xf32>
    tpu.vector_store %arg13[%c4_17, %c17], %18 {strides = array<i32>} : memref<24x32xf32, #tpu.memory_space<vmem>>, vector<4x15xf32>,
    %c8 = arith.constant 8 : index
    %c0_18 = arith.constant 0 : index
    %20 = vector.load %arg13[%c8, %c0_18] : memref<24x32xf32, #tpu.memory_space<vmem>>, vector<4x16xf32>
    tpu.vector_store %arg13[%c8, %c0_18], %1 {strides = array<i32>} : memref<24x32xf32, #tpu.memory_space<vmem>>, vector<4x16xf32>,
    %c8_19 = arith.constant 8 : index
    %c16_20 = arith.constant 16 : index
    %21 = vector.load %arg13[%c8_19, %c16_20] : memref<24x32xf32, #tpu.memory_space<vmem>>, vector<4x16xf32>
    tpu.vector_store %arg13[%c8_19, %c16_20], %3 {strides = array<i32>} : memref<24x32xf32, #tpu.memory_space<vmem>>, vector<4x16xf32>,
    %c0_21 = arith.constant 0 : index
    %c0_22 = arith.constant 0 : index
    %22 = vector.load %arg13[%c0_21, %c0_22] : memref<24x32xf32, #tpu.memory_space<vmem>>, vector<12x32xf32>
    %23 = vector.extract_strided_slice %22 {offsets = [8, 0], sizes = [4, 32], strides = [1, 1]} : vector<12x32xf32> to vector<4x32xf32>
    %c0_23 = arith.constant 0 : index
    %c0_24 = arith.constant 0 : index
    %24 = vector.load %arg2[%c0_23, %c0_24] : memref<8x12xf32, #tpu.memory_space<vmem>>, vector<8x12xf32>
    %cst_25 = arith.constant dense<0.000000e+00> : vector<8x32xf32>
    %25 = tpu.matmul %24, %22, %cst_25 {dimension_numbers = #tpu.dot_dimension_numbers<[1], [0], [0], [1], [0, 0, 1, 1], [], []>} : vector<8x12xf32>, vector<12x32xf32>, vector<8x32xf32> -> vector<8x32xf32>
    %c0_26 = arith.constant 0 : index
    %c0_27 = arith.constant 0 : index
    %26 = vector.load %arg3[%c0_26, %c0_27] : memref<8x1xf32, #tpu.memory_space<vmem>>, vector<8x1xf32>
    %27 = vector.broadcast %26 : vector<8x1xf32> to vector<8x32xf32>
    %28 = arith.addf %25, %27 : vector<8x32xf32>
    %cst_28 = arith.constant 0.000000e+00 : f32
    %29 = vector.broadcast %cst_28 : f32 to vector<8x32xf32>
    %30 = arith.maximumf %28, %29 : vector<8x32xf32>
    %c0_29 = arith.constant 0 : index
    %c0_30 = arith.constant 0 : index
    %31 = vector.load %arg6[%c0_29, %c0_30] : memref<8x4xf32, #tpu.memory_space<vmem>>, vector<8x4xf32>
    %cst_31 = arith.constant dense<0.000000e+00> : vector<8x32xf32>
    %32 = tpu.matmul %31, %23, %cst_31 {dimension_numbers = #tpu.dot_dimension_numbers<[1], [0], [0], [1], [0, 0, 1, 1], [], []>} : vector<8x4xf32>, vector<4x32xf32>, vector<8x32xf32> -> vector<8x32xf32>
    %c0_32 = arith.constant 0 : index
    %c0_33 = arith.constant 0 : index
    %33 = vector.load %arg7[%c0_32, %c0_33] : memref<8x1xf32, #tpu.memory_space<vmem>>, vector<8x1xf32>
    %34 = vector.broadcast %33 : vector<8x1xf32> to vector<8x32xf32>
    %35 = arith.addf %32, %34 : vector<8x32xf32>
    %cst_34 = arith.constant 0.000000e+00 : f32
    %36 = vector.broadcast %cst_34 : f32 to vector<8x2xf32>
    %c0_35 = arith.constant 0 : index
    %c0_36 = arith.constant 0 : index
    %37 = vector.load %arg13[%c0_35, %c0_36] : memref<24x32xf32, #tpu.memory_space<vmem>>, vector<8x2xf32>
    tpu.vector_store %arg13[%c0_35, %c0_36], %36 {strides = array<i32>} : memref<24x32xf32, #tpu.memory_space<vmem>>, vector<8x2xf32>,
    %38 = vector.extract_strided_slice %30 {offsets = [0, 0], sizes = [8, 14], strides = [1, 1]} : vector<8x32xf32> to vector<8x14xf32>
    %c0_37 = arith.constant 0 : index
    %c2_38 = arith.constant 2 : index
    %39 = vector.load %arg13[%c0_37, %c2_38] : memref<24x32xf32, #tpu.memory_space<vmem>>, vector<8x14xf32>
    tpu.vector_store %arg13[%c0_37, %c2_38], %38 {strides = array<i32>} : memref<24x32xf32, #tpu.memory_space<vmem>>, vector<8x14xf32>,
    %cst_39 = arith.constant 0.000000e+00 : f32
    %40 = vector.broadcast %cst_39 : f32 to vector<8x2xf32>
    %c0_40 = arith.constant 0 : index
    %c16_41 = arith.constant 16 : index
    %41 = vector.load %arg13[%c0_40, %c16_41] : memref<24x32xf32, #tpu.memory_space<vmem>>, vector<8x2xf32>
    tpu.vector_store %arg13[%c0_40, %c16_41], %40 {strides = array<i32>} : memref<24x32xf32, #tpu.memory_space<vmem>>, vector<8x2xf32>,
    %42 = vector.extract_strided_slice %30 {offsets = [0, 16], sizes = [8, 14], strides = [1, 1]} : vector<8x32xf32> to vector<8x14xf32>
    %c0_42 = arith.constant 0 : index
    %c18_43 = arith.constant 18 : index
    %43 = vector.load %arg13[%c0_42, %c18_43] : memref<24x32xf32, #tpu.memory_space<vmem>>, vector<8x14xf32>
    tpu.vector_store %arg13[%c0_42, %c18_43], %42 {strides = array<i32>} : memref<24x32xf32, #tpu.memory_space<vmem>>, vector<8x14xf32>,
    %cst_44 = arith.constant 0.000000e+00 : f32
    %44 = vector.broadcast %cst_44 : f32 to vector<8x1xf32>
    %c8_45 = arith.constant 8 : index
    %c0_46 = arith.constant 0 : index
    %45 = vector.load %arg13[%c8_45, %c0_46] : memref<24x32xf32, #tpu.memory_space<vmem>>, vector<8x1xf32>
    tpu.vector_store %arg13[%c8_45, %c0_46], %44 {strides = array<i32>} : memref<24x32xf32, #tpu.memory_space<vmem>>, vector<8x1xf32>,
    %46 = vector.extract_strided_slice %30 {offsets = [0, 0], sizes = [8, 15], strides = [1, 1]} : vector<8x32xf32> to vector<8x15xf32>
    %c8_47 = arith.constant 8 : index
    %c1_48 = arith.constant 1 : index
    %47 = vector.load %arg13[%c8_47, %c1_48] : memref<24x32xf32, #tpu.memory_space<vmem>>, vector<8x15xf32>
    tpu.vector_store %arg13[%c8_47, %c1_48], %46 {strides = array<i32>} : memref<24x32xf32, #tpu.memory_space<vmem>>, vector<8x15xf32>,
    %cst_49 = arith.constant 0.000000e+00 : f32
    %48 = vector.broadcast %cst_49 : f32 to vector<8x1xf32>
    %c8_50 = arith.constant 8 : index
    %c16_51 = arith.constant 16 : index
    %49 = vector.load %arg13[%c8_50, %c16_51] : memref<24x32xf32, #tpu.memory_space<vmem>>, vector<8x1xf32>
    tpu.vector_store %arg13[%c8_50, %c16_51], %48 {strides = array<i32>} : memref<24x32xf32, #tpu.memory_space<vmem>>, vector<8x1xf32>,
    %50 = vector.extract_strided_slice %30 {offsets = [0, 16], sizes = [8, 15], strides = [1, 1]} : vector<8x32xf32> to vector<8x15xf32>
    %c8_52 = arith.constant 8 : index
    %c17_53 = arith.constant 17 : index
    %51 = vector.load %arg13[%c8_52, %c17_53] : memref<24x32xf32, #tpu.memory_space<vmem>>, vector<8x15xf32>
    tpu.vector_store %arg13[%c8_52, %c17_53], %50 {strides = array<i32>} : memref<24x32xf32, #tpu.memory_space<vmem>>, vector<8x15xf32>,
    %52 = vector.extract_strided_slice %30 {offsets = [0, 0], sizes = [8, 16], strides = [1, 1]} : vector<8x32xf32> to vector<8x16xf32>
    %c16_54 = arith.constant 16 : index
    %c0_55 = arith.constant 0 : index
    %53 = vector.load %arg13[%c16_54, %c0_55] : memref<24x32xf32, #tpu.memory_space<vmem>>, vector<8x16xf32>
    tpu.vector_store %arg13[%c16_54, %c0_55], %52 {strides = array<i32>} : memref<24x32xf32, #tpu.memory_space<vmem>>, vector<8x16xf32>,
    %54 = vector.extract_strided_slice %30 {offsets = [0, 16], sizes = [8, 16], strides = [1, 1]} : vector<8x32xf32> to vector<8x16xf32>
    %c16_56 = arith.constant 16 : index
    %c16_57 = arith.constant 16 : index
    %55 = vector.load %arg13[%c16_56, %c16_57] : memref<24x32xf32, #tpu.memory_space<vmem>>, vector<8x16xf32>
    tpu.vector_store %arg13[%c16_56, %c16_57], %54 {strides = array<i32>} : memref<24x32xf32, #tpu.memory_space<vmem>>, vector<8x16xf32>,
    %c0_58 = arith.constant 0 : index
    %c0_59 = arith.constant 0 : index
    %56 = vector.load %arg13[%c0_58, %c0_59] : memref<24x32xf32, #tpu.memory_space<vmem>>, vector<24x32xf32>
    %c0_60 = arith.constant 0 : index
    %c0_61 = arith.constant 0 : index
    %57 = vector.load %arg4[%c0_60, %c0_61] : memref<8x24xf32, #tpu.memory_space<vmem>>, vector<8x24xf32>
    %cst_62 = arith.constant dense<0.000000e+00> : vector<8x32xf32>
    %58 = tpu.matmul %57, %56, %cst_62 {dimension_numbers = #tpu.dot_dimension_numbers<[1], [0], [0], [1], [0, 0, 1, 1], [], []>} : vector<8x24xf32>, vector<24x32xf32>, vector<8x32xf32> -> vector<8x32xf32>
    %c0_63 = arith.constant 0 : index
    %c0_64 = arith.constant 0 : index
    %59 = vector.load %arg5[%c0_63, %c0_64] : memref<8x1xf32, #tpu.memory_space<vmem>>, vector<8x1xf32>
    %60 = vector.broadcast %59 : vector<8x1xf32> to vector<8x32xf32>
    %61 = arith.addf %58, %60 : vector<8x32xf32>
    %cst_65 = arith.constant 0.000000e+00 : f32
    %62 = vector.broadcast %cst_65 : f32 to vector<8x32xf32>
    %63 = arith.maximumf %61, %62 : vector<8x32xf32>
    %64 = arith.addf %63, %35 : vector<8x32xf32>
    %cst_66 = arith.constant 0.000000e+00 : f32
    %65 = vector.broadcast %cst_66 : f32 to vector<8x32xf32>
    %66 = arith.maximumf %64, %65 : vector<8x32xf32>
    %cst_67 = arith.constant 0.000000e+00 : f32
    %67 = vector.broadcast %cst_67 : f32 to vector<8x4xf32>
    %c0_68 = arith.constant 0 : index
    %c0_69 = arith.constant 0 : index
    %68 = vector.load %arg13[%c0_68, %c0_69] : memref<24x32xf32, #tpu.memory_space<vmem>>, vector<8x4xf32>
    tpu.vector_store %arg13[%c0_68, %c0_69], %67 {strides = array<i32>} : memref<24x32xf32, #tpu.memory_space<vmem>>, vector<8x4xf32>,
    %69 = vector.extract_strided_slice %66 {offsets = [0, 0], sizes = [8, 12], strides = [1, 1]} : vector<8x32xf32> to vector<8x12xf32>
    %c0_70 = arith.constant 0 : index
    %c4_71 = arith.constant 4 : index
    %70 = vector.load %arg13[%c0_70, %c4_71] : memref<24x32xf32, #tpu.memory_space<vmem>>, vector<8x12xf32>
    tpu.vector_store %arg13[%c0_70, %c4_71], %69 {strides = array<i32>} : memref<24x32xf32, #tpu.memory_space<vmem>>, vector<8x12xf32>,
    %cst_72 = arith.constant 0.000000e+00 : f32
    %71 = vector.broadcast %cst_72 : f32 to vector<8x4xf32>
    %c0_73 = arith.constant 0 : index
    %c16_74 = arith.constant 16 : index
    %72 = vector.load %arg13[%c0_73, %c16_74] : memref<24x32xf32, #tpu.memory_space<vmem>>, vector<8x4xf32>
    tpu.vector_store %arg13[%c0_73, %c16_74], %71 {strides = array<i32>} : memref<24x32xf32, #tpu.memory_space<vmem>>, vector<8x4xf32>,
    %73 = vector.extract_strided_slice %66 {offsets = [0, 16], sizes = [8, 12], strides = [1, 1]} : vector<8x32xf32> to vector<8x12xf32>
    %c0_75 = arith.constant 0 : index
    %c20 = arith.constant 20 : index
    %74 = vector.load %arg13[%c0_75, %c20] : memref<24x32xf32, #tpu.memory_space<vmem>>, vector<8x12xf32>
    tpu.vector_store %arg13[%c0_75, %c20], %73 {strides = array<i32>} : memref<24x32xf32, #tpu.memory_space<vmem>>, vector<8x12xf32>,
    %cst_76 = arith.constant 0.000000e+00 : f32
    %75 = vector.broadcast %cst_76 : f32 to vector<8x2xf32>
    %c8_77 = arith.constant 8 : index
    %c0_78 = arith.constant 0 : index
    %76 = vector.load %arg13[%c8_77, %c0_78] : memref<24x32xf32, #tpu.memory_space<vmem>>, vector<8x2xf32>
    tpu.vector_store %arg13[%c8_77, %c0_78], %75 {strides = array<i32>} : memref<24x32xf32, #tpu.memory_space<vmem>>, vector<8x2xf32>,
    %77 = vector.extract_strided_slice %66 {offsets = [0, 0], sizes = [8, 14], strides = [1, 1]} : vector<8x32xf32> to vector<8x14xf32>
    %c8_79 = arith.constant 8 : index
    %c2_80 = arith.constant 2 : index
    %78 = vector.load %arg13[%c8_79, %c2_80] : memref<24x32xf32, #tpu.memory_space<vmem>>, vector<8x14xf32>
    tpu.vector_store %arg13[%c8_79, %c2_80], %77 {strides = array<i32>} : memref<24x32xf32, #tpu.memory_space<vmem>>, vector<8x14xf32>,
    %cst_81 = arith.constant 0.000000e+00 : f32
    %79 = vector.broadcast %cst_81 : f32 to vector<8x2xf32>
    %c8_82 = arith.constant 8 : index
    %c16_83 = arith.constant 16 : index
    %80 = vector.load %arg13[%c8_82, %c16_83] : memref<24x32xf32, #tpu.memory_space<vmem>>, vector<8x2xf32>
    tpu.vector_store %arg13[%c8_82, %c16_83], %79 {strides = array<i32>} : memref<24x32xf32, #tpu.memory_space<vmem>>, vector<8x2xf32>,
    %81 = vector.extract_strided_slice %66 {offsets = [0, 16], sizes = [8, 14], strides = [1, 1]} : vector<8x32xf32> to vector<8x14xf32>
    %c8_84 = arith.constant 8 : index
    %c18_85 = arith.constant 18 : index
    %82 = vector.load %arg13[%c8_84, %c18_85] : memref<24x32xf32, #tpu.memory_space<vmem>>, vector<8x14xf32>
    tpu.vector_store %arg13[%c8_84, %c18_85], %81 {strides = array<i32>} : memref<24x32xf32, #tpu.memory_space<vmem>>, vector<8x14xf32>,
    %83 = vector.extract_strided_slice %66 {offsets = [0, 0], sizes = [8, 16], strides = [1, 1]} : vector<8x32xf32> to vector<8x16xf32>
    %c16_86 = arith.constant 16 : index
    %c0_87 = arith.constant 0 : index
    %84 = vector.load %arg13[%c16_86, %c0_87] : memref<24x32xf32, #tpu.memory_space<vmem>>, vector<8x16xf32>
    tpu.vector_store %arg13[%c16_86, %c0_87], %83 {strides = array<i32>} : memref<24x32xf32, #tpu.memory_space<vmem>>, vector<8x16xf32>,
    %85 = vector.extract_strided_slice %66 {offsets = [0, 16], sizes = [8, 16], strides = [1, 1]} : vector<8x32xf32> to vector<8x16xf32>
    %c16_88 = arith.constant 16 : index
    %c16_89 = arith.constant 16 : index
    %86 = vector.load %arg13[%c16_88, %c16_89] : memref<24x32xf32, #tpu.memory_space<vmem>>, vector<8x16xf32>
    tpu.vector_store %arg13[%c16_88, %c16_89], %85 {strides = array<i32>} : memref<24x32xf32, #tpu.memory_space<vmem>>, vector<8x16xf32>,
    %c0_90 = arith.constant 0 : index
    %c0_91 = arith.constant 0 : index
    %87 = vector.load %arg13[%c0_90, %c0_91] : memref<24x32xf32, #tpu.memory_space<vmem>>, vector<24x32xf32>
    %88 = vector.extract_strided_slice %87 {offsets = [16, 0], sizes = [8, 32], strides = [1, 1]} : vector<24x32xf32> to vector<8x32xf32>
    %c0_92 = arith.constant 0 : index
    %c0_93 = arith.constant 0 : index
    %89 = vector.load %arg8[%c0_92, %c0_93] : memref<8x24xf32, #tpu.memory_space<vmem>>, vector<8x24xf32>
    %cst_94 = arith.constant dense<0.000000e+00> : vector<8x32xf32>
    %90 = tpu.matmul %89, %87, %cst_94 {dimension_numbers = #tpu.dot_dimension_numbers<[1], [0], [0], [1], [0, 0, 1, 1], [], []>} : vector<8x24xf32>, vector<24x32xf32>, vector<8x32xf32> -> vector<8x32xf32>
    %c0_95 = arith.constant 0 : index
    %c0_96 = arith.constant 0 : index
    %91 = vector.load %arg9[%c0_95, %c0_96] : memref<8x1xf32, #tpu.memory_space<vmem>>, vector<8x1xf32>
    %92 = vector.broadcast %91 : vector<8x1xf32> to vector<8x32xf32>
    %93 = arith.addf %90, %92 : vector<8x32xf32>
    %cst_97 = arith.constant 0.000000e+00 : f32
    %94 = vector.broadcast %cst_97 : f32 to vector<8x32xf32>
    %95 = arith.maximumf %93, %94 : vector<8x32xf32>
    %cst_98 = arith.constant 0.000000e+00 : f32
    %96 = vector.broadcast %cst_98 : f32 to vector<8x4xf32>
    %c0_99 = arith.constant 0 : index
    %c0_100 = arith.constant 0 : index
    %97 = vector.load %arg13[%c0_99, %c0_100] : memref<24x32xf32, #tpu.memory_space<vmem>>, vector<8x4xf32>
    tpu.vector_store %arg13[%c0_99, %c0_100], %96 {strides = array<i32>} : memref<24x32xf32, #tpu.memory_space<vmem>>, vector<8x4xf32>,
    %98 = vector.extract_strided_slice %95 {offsets = [0, 0], sizes = [8, 12], strides = [1, 1]} : vector<8x32xf32> to vector<8x12xf32>
    %c0_101 = arith.constant 0 : index
    %c4_102 = arith.constant 4 : index
    %99 = vector.load %arg13[%c0_101, %c4_102] : memref<24x32xf32, #tpu.memory_space<vmem>>, vector<8x12xf32>
    tpu.vector_store %arg13[%c0_101, %c4_102], %98 {strides = array<i32>} : memref<24x32xf32, #tpu.memory_space<vmem>>, vector<8x12xf32>,
    %cst_103 = arith.constant 0.000000e+00 : f32
    %100 = vector.broadcast %cst_103 : f32 to vector<8x4xf32>
    %c0_104 = arith.constant 0 : index
    %c16_105 = arith.constant 16 : index
    %101 = vector.load %arg13[%c0_104, %c16_105] : memref<24x32xf32, #tpu.memory_space<vmem>>, vector<8x4xf32>
    tpu.vector_store %arg13[%c0_104, %c16_105], %100 {strides = array<i32>} : memref<24x32xf32, #tpu.memory_space<vmem>>, vector<8x4xf32>,
    %102 = vector.extract_strided_slice %95 {offsets = [0, 16], sizes = [8, 12], strides = [1, 1]} : vector<8x32xf32> to vector<8x12xf32>
    %c0_106 = arith.constant 0 : index
    %c20_107 = arith.constant 20 : index
    %103 = vector.load %arg13[%c0_106, %c20_107] : memref<24x32xf32, #tpu.memory_space<vmem>>, vector<8x12xf32>
    tpu.vector_store %arg13[%c0_106, %c20_107], %102 {strides = array<i32>} : memref<24x32xf32, #tpu.memory_space<vmem>>, vector<8x12xf32>,
    %cst_108 = arith.constant 0.000000e+00 : f32
    %104 = vector.broadcast %cst_108 : f32 to vector<8x2xf32>
    %c8_109 = arith.constant 8 : index
    %c0_110 = arith.constant 0 : index
    %105 = vector.load %arg13[%c8_109, %c0_110] : memref<24x32xf32, #tpu.memory_space<vmem>>, vector<8x2xf32>
    tpu.vector_store %arg13[%c8_109, %c0_110], %104 {strides = array<i32>} : memref<24x32xf32, #tpu.memory_space<vmem>>, vector<8x2xf32>,
    %106 = vector.extract_strided_slice %95 {offsets = [0, 0], sizes = [8, 14], strides = [1, 1]} : vector<8x32xf32> to vector<8x14xf32>
    %c8_111 = arith.constant 8 : index
    %c2_112 = arith.constant 2 : index
    %107 = vector.load %arg13[%c8_111, %c2_112] : memref<24x32xf32, #tpu.memory_space<vmem>>, vector<8x14xf32>
    tpu.vector_store %arg13[%c8_111, %c2_112], %106 {strides = array<i32>} : memref<24x32xf32, #tpu.memory_space<vmem>>, vector<8x14xf32>,
    %cst_113 = arith.constant 0.000000e+00 : f32
    %108 = vector.broadcast %cst_113 : f32 to vector<8x2xf32>
    %c8_114 = arith.constant 8 : index
    %c16_115 = arith.constant 16 : index
    %109 = vector.load %arg13[%c8_114, %c16_115] : memref<24x32xf32, #tpu.memory_space<vmem>>, vector<8x2xf32>
    tpu.vector_store %arg13[%c8_114, %c16_115], %108 {strides = array<i32>} : memref<24x32xf32, #tpu.memory_space<vmem>>, vector<8x2xf32>,
    %110 = vector.extract_strided_slice %95 {offsets = [0, 16], sizes = [8, 14], strides = [1, 1]} : vector<8x32xf32> to vector<8x14xf32>
    %c8_116 = arith.constant 8 : index
    %c18_117 = arith.constant 18 : index
    %111 = vector.load %arg13[%c8_116, %c18_117] : memref<24x32xf32, #tpu.memory_space<vmem>>, vector<8x14xf32>
    tpu.vector_store %arg13[%c8_116, %c18_117], %110 {strides = array<i32>} : memref<24x32xf32, #tpu.memory_space<vmem>>, vector<8x14xf32>,
    %112 = vector.extract_strided_slice %95 {offsets = [0, 0], sizes = [8, 16], strides = [1, 1]} : vector<8x32xf32> to vector<8x16xf32>
    %c16_118 = arith.constant 16 : index
    %c0_119 = arith.constant 0 : index
    %113 = vector.load %arg13[%c16_118, %c0_119] : memref<24x32xf32, #tpu.memory_space<vmem>>, vector<8x16xf32>
    tpu.vector_store %arg13[%c16_118, %c0_119], %112 {strides = array<i32>} : memref<24x32xf32, #tpu.memory_space<vmem>>, vector<8x16xf32>,
    %114 = vector.extract_strided_slice %95 {offsets = [0, 16], sizes = [8, 16], strides = [1, 1]} : vector<8x32xf32> to vector<8x16xf32>
    %c16_120 = arith.constant 16 : index
    %c16_121 = arith.constant 16 : index
    %115 = vector.load %arg13[%c16_120, %c16_121] : memref<24x32xf32, #tpu.memory_space<vmem>>, vector<8x16xf32>
    tpu.vector_store %arg13[%c16_120, %c16_121], %114 {strides = array<i32>} : memref<24x32xf32, #tpu.memory_space<vmem>>, vector<8x16xf32>,
    %c0_122 = arith.constant 0 : index
    %c0_123 = arith.constant 0 : index
    %116 = vector.load %arg13[%c0_122, %c0_123] : memref<24x32xf32, #tpu.memory_space<vmem>>, vector<24x32xf32>
    %c0_124 = arith.constant 0 : index
    %c0_125 = arith.constant 0 : index
    %117 = vector.load %arg10[%c0_124, %c0_125] : memref<8x24xf32, #tpu.memory_space<vmem>>, vector<8x24xf32>
    %cst_126 = arith.constant dense<0.000000e+00> : vector<8x32xf32>
    %118 = tpu.matmul %117, %116, %cst_126 {dimension_numbers = #tpu.dot_dimension_numbers<[1], [0], [0], [1], [0, 0, 1, 1], [], []>} : vector<8x24xf32>, vector<24x32xf32>, vector<8x32xf32> -> vector<8x32xf32>
    %c0_127 = arith.constant 0 : index
    %c0_128 = arith.constant 0 : index
    %119 = vector.load %arg11[%c0_127, %c0_128] : memref<8x1xf32, #tpu.memory_space<vmem>>, vector<8x1xf32>
    %120 = vector.broadcast %119 : vector<8x1xf32> to vector<8x32xf32>
    %121 = arith.addf %118, %120 : vector<8x32xf32>
    %cst_129 = arith.constant 0.000000e+00 : f32
    %122 = vector.broadcast %cst_129 : f32 to vector<8x32xf32>
    %123 = arith.maximumf %121, %122 : vector<8x32xf32>
    %124 = arith.addf %123, %88 : vector<8x32xf32>
    %cst_130 = arith.constant 0.000000e+00 : f32
    %125 = vector.broadcast %cst_130 : f32 to vector<8x32xf32>
    %126 = arith.maximumf %124, %125 : vector<8x32xf32>
    %c0_131 = arith.constant 0 : index
    %c0_132 = arith.constant 0 : index
    %127 = vector.load %arg12[%c0_131, %c0_132] : memref<8x32xf32, #tpu.memory_space<vmem>>, vector<8x32xf32>
    tpu.vector_store %arg12[%c0_131, %c0_132], %126 {strides = array<i32>} : memref<8x32xf32, #tpu.memory_space<vmem>>, vector<8x32xf32>,
    return
  }
  func.func @transform_0(%arg0: i32) -> (i32, i32, i32) {
    %c0_i32 = arith.constant 0 : i32
    %c0_i32_0 = arith.constant 0 : i32
    %c0_i32_1 = arith.constant 0 : i32
    return %arg0, %c0_i32, %c0_i32_0 : i32, i32, i32
  }
  func.func @transform_1(%arg0: i32) -> (i32, i32) {
    %c0_i32 = arith.constant 0 : i32
    %c0_i32_0 = arith.constant 0 : i32
    %c0_i32_1 = arith.constant 0 : i32
    return %c0_i32, %c0_i32_0 : i32, i32
  }
  func.func @transform_2(%arg0: i32) -> (i32, i32) {
    %c0_i32 = arith.constant 0 : i32
    %c0_i32_0 = arith.constant 0 : i32
    %c0_i32_1 = arith.constant 0 : i32
    return %c0_i32, %c0_i32_0 : i32, i32
  }
  func.func @transform_3(%arg0: i32) -> (i32, i32) {
    %c0_i32 = arith.constant 0 : i32
    %c0_i32_0 = arith.constant 0 : i32
    %c0_i32_1 = arith.constant 0 : i32
    return %c0_i32, %c0_i32_0 : i32, i32
  }
  func.func @transform_4(%arg0: i32) -> (i32, i32) {
    %c0_i32 = arith.constant 0 : i32
    %c0_i32_0 = arith.constant 0 : i32
    %c0_i32_1 = arith.constant 0 : i32
    return %c0_i32, %c0_i32_0 : i32, i32
  }
  func.func @transform_5(%arg0: i32) -> (i32, i32) {
    %c0_i32 = arith.constant 0 : i32
    %c0_i32_0 = arith.constant 0 : i32
    %c0_i32_1 = arith.constant 0 : i32
    return %c0_i32, %c0_i32_0 : i32, i32
  }
  func.func @transform_6(%arg0: i32) -> (i32, i32) {
    %c0_i32 = arith.constant 0 : i32
    %c0_i32_0 = arith.constant 0 : i32
    %c0_i32_1 = arith.constant 0 : i32
    return %c0_i32, %c0_i32_0 : i32, i32
  }
  func.func @transform_7(%arg0: i32) -> (i32, i32) {
    %c0_i32 = arith.constant 0 : i32
    %c0_i32_0 = arith.constant 0 : i32
    %c0_i32_1 = arith.constant 0 : i32
    return %c0_i32, %c0_i32_0 : i32, i32
  }
  func.func @transform_8(%arg0: i32) -> (i32, i32) {
    %c0_i32 = arith.constant 0 : i32
    %c0_i32_0 = arith.constant 0 : i32
    %c0_i32_1 = arith.constant 0 : i32
    return %c0_i32, %c0_i32_0 : i32, i32
  }
  func.func @transform_9(%arg0: i32) -> (i32, i32) {
    %c0_i32 = arith.constant 0 : i32
    %c0_i32_0 = arith.constant 0 : i32
    %c0_i32_1 = arith.constant 0 : i32
    return %c0_i32, %c0_i32_0 : i32, i32
  }
  func.func @transform_10(%arg0: i32) -> (i32, i32) {
    %c0_i32 = arith.constant 0 : i32
    %c0_i32_0 = arith.constant 0 : i32
    %c0_i32_1 = arith.constant 0 : i32
    return %c0_i32, %c0_i32_0 : i32, i32
  }
  func.func @transform_11(%arg0: i32) -> (i32, i32) {
    %c0_i32 = arith.constant 0 : i32
    %c0_i32_0 = arith.constant 0 : i32
    return %c0_i32, %arg0 : i32, i32
  }
}

</mosaic_0001>

<bundles_post_ra>
// kernel: tpu_custom_call.1
= control target key start
LH: loop header
LB: loop body
LE: loop exit
PB: predicated region body
PF: predicated region fallthrough
CT: control target
= control target key end

     0   :  { %s700_s21 = smov 2   ;;  %s701_s22 = smov 18   ;;  %vm42_vm0 = vcmask 11264   ;;  %v702_v2 = vmov 0.0   ;;  %vm58_vm1 = vcmask 3072   ;;  %vm72_vm2 = vcmask 125952   ;;  %s892_s0 = inlined_call_operand.vmem [shape: f32[2,4,16], index: 0, kind: input, shape index: {}]   ;;  %s893_s1 = inlined_call_operand.vmem [shape: f32[8,12], index: 1, kind: input, shape index: {}]   ;;  %s894_s2 = inlined_call_operand.vmem [shape: f32[8,1], index: 2, kind: input, shape index: {}]   ;;  %s895_s3 = inlined_call_operand.vmem [shape: f32[8,24], index: 3, kind: input, shape index: {}]   ;;  %s896_s4 = inlined_call_operand.vmem [shape: f32[8,1], index: 4, kind: input, shape index: {}]   ;;  %s897_s5 = inlined_call_operand.vmem [shape: f32[8,4], index: 5, kind: input, shape index: {}]   ;;  %s898_s6 = inlined_call_operand.vmem [shape: f32[8,1], index: 6, kind: input, shape index: {}]   ;;  %s899_s7 = inlined_call_operand.vmem [shape: f32[8,24], index: 7, kind: input, shape index: {}]   ;;  %s900_s8 = inlined_call_operand.vmem [shape: f32[8,1], index: 8, kind: input, shape index: {}]   ;;  %s901_s9 = inlined_call_operand.vmem [shape: f32[8,24], index: 9, kind: input, shape index: {}]   ;;  %s902_s10 = inlined_call_operand.vmem [shape: f32[8,1], index: 10, kind: input, shape index: {}]   ;;  %s903_s11 = inlined_call_operand.hbm [shape: f32[8,32], index: 11, kind: output, shape index: {}]  }
   0x1   :  { %v39_v0 = vld [vmem:[%s892_s0] sm:$0xf]  ;;  %v585_v1 = vld [vmem:[%s892_s0 + $0x4] sm:$0xf]  ;;  %43 = vst.msk [vmem:[#allocation2] sm:$0xf] %vm42_vm0, %v702_v2  ;;  %617 = vmatprep.subr.mxu1 %v702_v2 }
   0x2   :  { %45 = vrot.lane.b32.xlu0 %v39_v0, %s700_s21  ;;  %53 = vrot.lane.b32.xlu1 %v585_v1, %s701_s22  ;;  %59 = vst.msk [vmem:[#allocation2 + $0x4] sm:$0xf] %vm58_vm1, %v702_v2 }
   0x3   :  { %16 = vsyncpa [#allocation4], 0  ;;  %73 = vst.msk [vmem:[#allocation2 + $0x8] sm:$0xf] %vm72_vm2, %v39_v0  ;;  %s703_s23 = smov 1   ;;  %s704_s0 = smov 17  }
   0x4   :  { %v705_v3 = vmov 0.0|0.0   ;;  %vm706_vm3 = vmmov 0   ;;  %s707_s24 = smov 16   ;;  %v82_v4 = vld [vmem:[%s894_s2] sm:$0xff]  ;;  %v708_v5 = vmov 0   ;;  %vm48_vm4 = vcmask 125968  }
   0x5   :  { %649 = vmatprep.subr.bf16.mxu0 %v705_v3  ;;  %614 = vmatprep.mubr.msk.f32.mxu0 %vm706_vm3, %v702_v2  ;;  %vm50_vm5 = vcmask 142464   ;;  %vm56_vm6 = vcmask 257168   ;;  %vm63_vm7 = vcmask 125960   ;;  %vm65_vm8 = vcmask 134272   ;;  %v167_v11 = vld [vmem:[%s897_s5] sm:$0xff]  ;;  %s711_s18 = smov [#allocation3]  }
   0x6   :  { %60 = vrot.lane.b32.xlu0 %v39_v0, %s703_s23  ;;  %67 = vrot.lane.b32.xlu1 %v585_v1, %s704_s0  ;;  %vm70_vm9 = vcmask 257160   ;;  %vm77_vm10 = vcmask 257152   ;;  %vm92_vm11 = vcmask 1043456   ;;  %vm174_vm12 = vcmask 31744   ;;  %v81_v15 = vld [vmem:[%s893_s1] sm:$0xff]  ;;  %s577_s19 = sshll.u32 %s711_s18, 4  ;;  %s578_s19 = int_to_ptr.vmem [resolvable:$true] %s577_s19 }
   0x7   :  { %619 = vmatprep.mubr.msk.f32.mxu1 %vm706_vm3, %v702_v2  ;;  %674 = vset.pattern.permute.xlu1 %v708_v5  ;;  %vm709_vm13 = vmmov 1   ;;  %vm88_vm15 = vcmask 97280   ;;  %vm260_vm0 = vcmask 7168   ;;  %vm248_vm1 = vcmask 15360   ;;  %v168_v22 = vld [vmem:[%s898_s6] sm:$0xff]  ;;  %s676_s20 = scalar_lea.vmem %s578_s19, 128  ;;  %p681_p1 = scmp.lt.s32.totalorder %s578_s19, %s578_s19 }
   0x8   :  { %675 = vset.pattern.permute.xlu0 %v708_v5  ;;  %vm651_vm14 = vmpackc.low %vm92_vm11, %vm709_vm13  ;;  %vm271_vm2 = vcmask 130048   ;;  %v279_v24 = vld [vmem:[%s896_s4] sm:$0xff]  ;;  %vm369_vm13 = vcmask 162944   ;;  %p677_p0 = scmp.ne.s32.totalorder %s578_s19, %s676_s20  ;;  %p682_p2 = scmp.lt.s32.totalorder %s676_s20, %s676_s20 }
   0x9   :  { %v278_v30 = vld [vmem:[%s895_s3] sm:$0xff]  ;;  %s710_s3 = smov 4  }
   0xa   :  { %74 = vrot.lane.b32.xlu0 %v585_v1, %s707_s24  ;;  %85 = vperm.xlu1 %674, %v82_v4   ;;  %v386_v41 = vld [vmem:[%s900_s8] sm:$0xff]  ;;  %p683_p3 = por %p682_p2, %p681_p1 }
   0xb   :  { %v385_v47 = vld [vmem:[%s899_s7] sm:$0xff] }
   0xc   :  { %v487_v54 = vld [vmem:[%s902_s10] sm:$0xff]  ;;  %p684_p4 = pnand %p683_p3, %p677_p0 }
   0xd   :  { %v486_v60 = vld [vmem:[%s901_s9] sm:$0xff] }
  0x74   :  { %v46_v6 = vpop.permute.xlu0 %45  ;;  %v54_v7 = vpop.permute.xlu1 %53 }
  0x75   :  { %49 = vst.msk [vmem:[#allocation2] sm:$0xf] %vm48_vm4, %v46_v6  ;;  %vm273_vm4 = vcmask 261248  }
  0x76   :  { %51 = vst.msk [vmem:[#allocation2] sm:$0xf] %vm50_vm5, %v702_v2  ;;  %vm265_vm5 = vcmask 130056  }
  0x77   :  { %57 = vst.msk [vmem:[#allocation2] sm:$0xf] %vm56_vm6, %v54_v7  ;;  %vm254_vm6 = vcmask 130064  }
  0x78   :  { %v61_v8 = vpop.permute.xlu0 %60  ;;  %v68_v9 = vpop.permute.xlu1 %67 }
  0x79   :  { %64 = vst.msk [vmem:[#allocation2 + $0x4] sm:$0xf] %vm63_vm7, %v61_v8  ;;  %vm267_vm7 = vcmask 138368  }
  0x7a   :  { %66 = vst.msk [vmem:[#allocation2 + $0x4] sm:$0xf] %vm65_vm8, %v702_v2  ;;  %vm256_vm8 = vcmask 146560  }
  0x7b   :  { %71 = vst.msk [vmem:[#allocation2 + $0x4] sm:$0xf] %vm70_vm9, %v68_v9  ;;  %vm269_vm9 = vcmask 261256  }
  0x7c   :  { %v75_v10 = vpop.permute.xlu0 %74 }
  0x7d   :  { %78 = vst.msk [vmem:[#allocation2 + $0x8] sm:$0xf] %vm77_vm10, %v75_v10  ;;  %vm258_vm10 = vcmask 261264  }
  0x82   :  { %v79_v13 = vld [vmem:[#allocation2] sm:$0xff] }
  0x83   :  { %249 = vst.msk [vmem:[#allocation2] sm:$0xff] %vm248_vm1, %v702_v2 }
  0x84   :  { %v80_v12 = vld [vmem:[#allocation2 + $0x8] sm:$0xf] }
  0x85   :  { %618 = vmatpush3.msk.msra.mxu1 %vm92_vm11, %v80_v12  ;;  %v650_v14 = vpack.c.bf16 %v80_v12, %v79_v13  ;;  %261 = vst.msk [vmem:[#allocation2 + $0x8] sm:$0xff] %vm260_vm0, %v702_v2  ;;  %vm285_vm11 = vcmask 195584  }
  0x86   :  { %620 = vmatmul.mubr.msk.f32.vlgmr.msra.gmra.mrb[0].mxu1 %vm174_vm12, %v167_v11  ;;  %653 = vmatprep.subr.bf16.mxu1 %v705_v3 }
  0x87   :  { %652 = vmatpush3.bf16.msk.msra.mxu0 %vm651_vm14, %v650_v14  ;;  %628 = vmatprep.mubr.msk.f32.mxu1 %vm706_vm3, %v702_v2  ;;  %vm371_vm14 = vcmask 261280  }
  0x88   :  { %656 = vmatprep.subr.bf16.mxu0 %v705_v3 }
  0x89   :  { %v86_v16 = vpop.permute.xlu1 %85 }
  0x8a   :  { %615 = vmatmul.mubr.msk.f32.vlgmr.msra.gmra.mrb[0].mxu0 %vm88_vm15, %v81_v15 }
  0x8b   :  { %637 = vmatprep.mubr.msk.f32.mxu0 %vm706_vm3, %v702_v2 }
 0x159   :  { %v244_v21 = vpop.f32.mrb[0].mxu1 }
 0x15a   :  { %v621_v23 = vpop.f32.mrb[1].mxu1 }
 0x15d   :  { %v162_v17 = vpop.f32.mrb[0].mxu0 }
 0x15e   :  { %v163_v18 = vadd.f32 %v162_v17, %v86_v16  ;;  %v616_v19 = vpop.f32.mrb[1].mxu0 }
 0x160   :  { %v166_v20 = vmax.f32 %v163_v18, 0.0 }
 0x162   :  { %272 = vst.msk [vmem:[#allocation2 + $0x10] sm:$0xff] %vm271_vm2, %v166_v20  ;;  %262 = vrot.lane.b32.xlu1 %v166_v20, %s703_s23  ;;  %251 = vrot.lane.b32.xlu0 %v166_v20, %s700_s21 }
 0x163   :  { %274 = vst.msk [vmem:[#allocation2 + $0x10] sm:$0xff] %vm273_vm4, %v166_v20 }
 0x166   :  { %171 = vperm.xlu1 %674, %v168_v22   ;;  %282 = vperm.xlu0 %675, %v279_v24  }
 0x16a   :  { %v277_v31 = vld [vmem:[#allocation2 + $0x10] sm:$0xff] }
 0x1d4   :  { %v263_v25 = vpop.permute.xlu1 %262  ;;  %v252_v26 = vpop.permute.xlu0 %251 }
 0x1d5   :  { %266 = vst.msk [vmem:[#allocation2 + $0x8] sm:$0xff] %vm265_vm5, %v263_v25 }
 0x1d6   :  { %255 = vst.msk [vmem:[#allocation2] sm:$0xff] %vm254_vm6, %v252_v26 }
 0x1d7   :  { %268 = vst.msk [vmem:[#allocation2 + $0x8] sm:$0xff] %vm267_vm7, %v702_v2 }
 0x1d8   :  { %257 = vst.msk [vmem:[#allocation2] sm:$0xff] %vm256_vm8, %v702_v2 }
 0x1d9   :  { %270 = vst.msk [vmem:[#allocation2 + $0x8] sm:$0xff] %vm269_vm9, %v263_v25 }
 0x1da   :  { %259 = vst.msk [vmem:[#allocation2] sm:$0xff] %vm258_vm10, %v252_v26 }
 0x1e0   :  { %v276_v28 = vld [vmem:[#allocation2 + $0x8] sm:$0xff] }
 0x1e1   :  { %v275_v27 = vld [vmem:[#allocation2] sm:$0xff]  ;;  %373 = vst.msk [vmem:[#allocation2 + $0x8] sm:$0xff] %vm248_vm1, %v702_v2 }
 0x1e2   :  { %v654_v29 = vpack.c.bf16 %v276_v28, %v275_v27  ;;  %362 = vst.msk [vmem:[#allocation2] sm:$0xff] %vm174_vm12, %v702_v2 }
 0x1e4   :  { %655 = vmatpush3.bf16.msra.mxu1 %v654_v29 }
 0x1e5   :  { %626 = vmatprep.subr.mxu1 %v702_v2  ;;  %v283_v32 = vpop.permute.xlu0 %282  ;;  %v172_v33 = vpop.permute.xlu1 %171 }
 0x1e6   :  { %v245_v37 = vadd.f32 %v244_v21, %v172_v33 }
 0x1e8   :  { %627 = vmatpush3.msra.mxu1 %v277_v31 }
 0x1e9   :  { %629 = vmatmul.mubr.msk.f32.vlgmr.msra.gmra.mrb[2].mxu1 %vm285_vm11, %v278_v30  ;;  %659 = vmatprep.subr.bf16.mxu1 %v705_v3 }
 0x1ea   :  { %646 = vmatprep.mubr.msk.f32.mxu1 %vm706_vm3, %v702_v2  ;;  %vm367_vm3 = vcmask 130080  }
 0x2bc   :  { %v355_v34 = vpop.f32.mrb[2].mxu1 }
 0x2bd   :  { %v356_v35 = vadd.f32 %v355_v34, %v283_v32  ;;  %v630_v36 = vpop.f32.mrb[3].mxu1 }
 0x2bf   :  { %v359_v38 = vmax.f32 %v356_v35, 0.0 }
 0x2c1   :  { %v360_v39 = vadd.f32 %v359_v38, %v245_v37 }
 0x2c3   :  { %v361_v40 = vmax.f32 %v360_v39, 0.0 }
 0x2c5   :  { %380 = vst.msk [vmem:[#allocation2 + $0x10] sm:$0xff] %vm271_vm2, %v361_v40  ;;  %374 = vrot.lane.b32.xlu0 %v361_v40, %s700_s21  ;;  %364 = vrot.lane.b32.xlu1 %v361_v40, %s710_s3 }
 0x2c6   :  { %381 = vst.msk [vmem:[#allocation2 + $0x10] sm:$0xff] %vm273_vm4, %v361_v40 }
 0x2c9   :  { %389 = vperm.xlu1 %674, %v386_v41  }
 0x2cd   :  { %v384_v48 = vld [vmem:[#allocation2 + $0x10] sm:$0xff] }
 0x337   :  { %v375_v42 = vpop.permute.xlu0 %374  ;;  %v365_v43 = vpop.permute.xlu1 %364 }
 0x338   :  { %377 = vst.msk [vmem:[#allocation2 + $0x8] sm:$0xff] %vm254_vm6, %v375_v42 }
 0x339   :  { %368 = vst.msk [vmem:[#allocation2] sm:$0xff] %vm367_vm3, %v365_v43 }
 0x33a   :  { %378 = vst.msk [vmem:[#allocation2 + $0x8] sm:$0xff] %vm256_vm8, %v702_v2 }
 0x33b   :  { %370 = vst.msk [vmem:[#allocation2] sm:$0xff] %vm369_vm13, %v702_v2 }
 0x33c   :  { %379 = vst.msk [vmem:[#allocation2 + $0x8] sm:$0xff] %vm258_vm10, %v375_v42 }
 0x33d   :  { %372 = vst.msk [vmem:[#allocation2] sm:$0xff] %vm371_vm14, %v365_v43 }
 0x343   :  { %v383_v45 = vld [vmem:[#allocation2 + $0x8] sm:$0xff] }
 0x344   :  { %v382_v44 = vld [vmem:[#allocation2] sm:$0xff]  ;;  %474 = vst.msk [vmem:[#allocation2 + $0x8] sm:$0xff] %vm248_vm1, %v702_v2 }
 0x345   :  { %v657_v46 = vpack.c.bf16 %v383_v45, %v382_v44  ;;  %466 = vst.msk [vmem:[#allocation2] sm:$0xff] %vm174_vm12, %v702_v2  ;;  %vm569_vm12 = vcmask 261120  }
 0x347   :  { %658 = vmatpush3.bf16.msra.mxu0 %v657_v46 }
 0x348   :  { %635 = vmatprep.subr.mxu0 %v702_v2  ;;  %v390_v49 = vpop.permute.xlu1 %389 }
 0x34b   :  { %636 = vmatpush3.msra.mxu0 %v384_v48 }
 0x34c   :  { %638 = vmatmul.mubr.msk.f32.vlgmr.msra.gmra.mrb[2].mxu0 %vm285_vm11, %v385_v47 }
 0x41f   :  { %v461_v50 = vpop.f32.mrb[2].mxu0 }
 0x420   :  { %v462_v51 = vadd.f32 %v461_v50, %v390_v49  ;;  %v639_v52 = vpop.f32.mrb[3].mxu0 }
 0x422   :  { %v465_v53 = vmax.f32 %v462_v51, 0.0 }
 0x424   :  { %481 = vst.msk [vmem:[#allocation2 + $0x10] sm:$0xff] %vm271_vm2, %v465_v53  ;;  %475 = vrot.lane.b32.xlu1 %v465_v53, %s700_s21  ;;  %468 = vrot.lane.b32.xlu0 %v465_v53, %s710_s3 }
 0x425   :  { %482 = vst.msk [vmem:[#allocation2 + $0x10] sm:$0xff] %vm273_vm4, %v465_v53 }
 0x428   :  { %490 = vperm.xlu0 %675, %v487_v54  }
 0x42c   :  { %v485_v61 = vld [vmem:[#allocation2 + $0x10] sm:$0xff] }
 0x496   :  { %v476_v55 = vpop.permute.xlu1 %475  ;;  %v469_v56 = vpop.permute.xlu0 %468 }
 0x497   :  { %478 = vst.msk [vmem:[#allocation2 + $0x8] sm:$0xff] %vm254_vm6, %v476_v55 }
 0x498   :  { %471 = vst.msk [vmem:[#allocation2] sm:$0xff] %vm367_vm3, %v469_v56 }
 0x499   :  { %479 = vst.msk [vmem:[#allocation2 + $0x8] sm:$0xff] %vm256_vm8, %v702_v2 }
 0x49a   :  { %472 = vst.msk [vmem:[#allocation2] sm:$0xff] %vm369_vm13, %v702_v2 }
 0x49b   :  { %480 = vst.msk [vmem:[#allocation2 + $0x8] sm:$0xff] %vm258_vm10, %v476_v55 }
 0x49c   :  { %473 = vst.msk [vmem:[#allocation2] sm:$0xff] %vm371_vm14, %v469_v56 }
 0x4a2   :  { %v484_v58 = vld [vmem:[#allocation2 + $0x8] sm:$0xff] }
 0x4a3   :  { %v483_v57 = vld [vmem:[#allocation2] sm:$0xff] }
 0x4a4   :  { %v660_v59 = vpack.c.bf16 %v484_v58, %v483_v57 }
 0x4a6   :  { %661 = vmatpush3.bf16.msra.mxu1 %v660_v59 }
 0x4a7   :  { %644 = vmatprep.subr.mxu1 %v702_v2  ;;  %v491_v62 = vpop.permute.xlu0 %490 }
 0x4aa   :  { %645 = vmatpush3.msra.mxu1 %v485_v61 }
 0x4ab   :  { %647 = vmatmul.mubr.msk.f32.vlgmr.msra.gmra.mrb[4].mxu1 %vm285_vm11, %v486_v60 }
 0x57e   :  { %v562_v63 = vpop.f32.mrb[4].mxu1 }
 0x57f   :  { %v563_v0 = vadd.f32 %v562_v63, %v491_v62  ;;  %v648_v1 = vpop.f32.mrb[5].mxu1 }
 0x581   :  { %v566_v3 = vmax.f32 %v563_v0, 0.0 }
 0x583   :  { %v567_v4 = vadd.f32 %v566_v3, %v384_v48 }
 0x585   :  { %v568_v5 = vmax.f32 %v567_v4, 0.0 }
 0x587   :  { %570 = vst.msk [vmem:[#allocation3] sm:$0xff] %vm569_vm12, %v568_v5 }
 0x588   :  { %687 = shalt.err (!%p684_p4)
}
 0x589   :  { %s688_s22 = scalar_lea.hbm %s903_s11, 128 }
 0x58a   :  { %p689_p5 = scmp.ne.s32.totalorder %s903_s11, %s688_s22  ;;  %p692_p6 = scmp.lt.u32.totalorder %s688_s22, %s903_s11 }
 0x58c   :  { %p694_p7 = pnand %p692_p6, %p689_p5 }
 0x58e   :  { %697 = shalt.err (!%p694_p7)
}
 0x58f   :  { %580 = dma.vmem_to_hbm [thread:$0]  %s578_s19, 128, %s903_s11, [#allocation4]  }
 0x590   :  { %698 = dma.done.wait [#allocation4], 128  }
 0x591   :  { %699 = vsyncadd [#allocation4], 4294967168 }
 0x592   :  { %584 = vsyncpa [#allocation4], 1 }

</bundles_post_ra>
